<compile_context>
chip_gen: v5e
topology: v5e:2x2
jax: 0.10.0
libtpu: 0.0.40
codegen_flags: <defaults>
</compile_context>

<pallas_src>
import jax
import jax.numpy as jnp
from jax.experimental import pallas as pl
from jax.experimental.pallas import tpu as pltpu

_TM_MAX = 2048                      # upper bound on the lane (M) tile
_VMEM_BUDGET = 24 * 1024 * 1024     # headroom under the 32 MiB scoped-VMEM limit


def _round_up(x, m):
    return (x + m - 1) // m * m


def _conv_kernel(w_ref, p_ref, b_ref, o_ref):
    # w: (Cout_pad, K_pad) bf16   p: (K_pad, TM) bf16
    # b: (Cout_pad, 1)     f32    o: (Cout_pad, TM) out dtype
    acc = jnp.dot(w_ref[...], p_ref[...], preferred_element_type=jnp.float32)
    o_ref[...] = (acc + b_ref[...]).astype(o_ref.dtype)


def _im2col_t(x_bf16, kh, kw):
    """x: (N, C, H, W) bf16 -> patches^T: (C*KH*KW, N*H*W); 'same' pad, stride 1."""
    n, c, h, w = x_bf16.shape
    ph, pw = kh // 2, kw // 2
    xp = jnp.pad(x_bf16, ((0, 0), (0, 0), (ph, ph), (pw, pw)))
    cols = [xp[:, :, i:i + h, j:j + w] for i in range(kh) for j in range(kw)]
    pat = jnp.stack(cols, axis=0)                 # (KHKW, N, C, H, W)
    pat = jnp.transpose(pat, (2, 0, 1, 3, 4))     # (C, KHKW, N, H, W) - leading axes only
    return pat.reshape(c * kh * kw, n * h * w)    # (K, M), bf16


def _pick_tile_m(M, k_p, cout_p, out_bytes):
    """Largest 128-multiple M tile whose double-buffered working set fits VMEM."""
    tm_need = _round_up(M, 128)

    def usage(tm):
        return (2 * k_p * tm * 2               # patch tile (bf16), double-buffered
                + 2 * cout_p * tm * out_bytes  # output tile, double-buffered
                + 2 * cout_p * k_p * 2         # resident weights (conservative x2)
                + 2 * cout_p * 4)              # bias

    tm = 128
    for cand in (2048, 1024, 512, 256, 128):
        t = min(cand, tm_need, _TM_MAX)
        if usage(t) <= _VMEM_BUDGET:
            tm = t
            break
    return max(tm, 128)


@jax.jit
def conv2d_masked(x, weight, bias, channel_mask):
    """Conv2d (stride 1, 'same' padding) + bias, with a per-output-channel
    mask folded into the weights/bias, as one tiled Pallas matmul."""
    n, c, h, w = x.shape
    cout, cin, kh, kw = weight.shape
    assert c == cin, "input channels must match weight"
    assert kh % 2 == 1 and kw % 2 == 1, "'same' padding assumes odd kernel dims"

    M = n * h * w
    K = cin * kh * kw
    out_dtype = x.dtype
    out_bytes = jnp.dtype(out_dtype).itemsize

    # Fold mask into weights + bias (mask is applied after bias in the original
    # module, i.e. masked channels output exactly 0 incl. bias -> zero both).
    mask = channel_mask.astype(jnp.float32).reshape(cout, 1)
    w_masked = weight.reshape(cout, K).astype(jnp.float32) * mask
    b_masked = bias.astype(jnp.float32).reshape(cout, 1) * mask

    # Pad to TPU-friendly shapes.
    cout_p = _round_up(cout, 8)            # sublane dim of the output tile
    k_p = _round_up(K, 16)                 # bf16 packs 16 rows per vreg
    tm = _pick_tile_m(M, k_p, cout_p, out_bytes)   # lane-dense M tile
    m_p = _round_up(M, tm)

    patches = _im2col_t(x.astype(jnp.bfloat16), kh, kw)                # (K, M) bf16
    patches = jnp.pad(patches, ((0, k_p - K), (0, m_p - M)))
    w_p = jnp.pad(w_masked, ((0, cout_p - cout), (0, k_p - K))).astype(jnp.bfloat16)
    b_p = jnp.pad(b_masked, ((0, cout_p - cout), (0, 0)))              # f32

    grid = (m_p // tm,)
    cost = pl.CostEstimate(
        flops=2 * m_p * k_p * cout_p,
        transcendentals=0,
        bytes_accessed=(patches.size * 2 + w_p.size * 2 + b_p.size * 4
                        + cout_p * m_p * out_bytes),
    )

    out = pl.pallas_call(
        _conv_kernel,
        out_shape=jax.ShapeDtypeStruct((cout_p, m_p), out_dtype),
        grid_spec=pltpu.PrefetchScalarGridSpec(
            num_scalar_prefetch=0,
            grid=grid,
            in_specs=[
                pl.BlockSpec((cout_p, k_p), lambda i: (0, 0)),   # weights (resident)
                pl.BlockSpec((k_p, tm), lambda i: (0, i)),       # patch tile
                pl.BlockSpec((cout_p, 1), lambda i: (0, 0)),     # bias (resident)
            ],
            out_specs=pl.BlockSpec((cout_p, tm), lambda i: (0, i)),
        ),
        compiler_params=pltpu.CompilerParams(
            dimension_semantics=("parallel",),          # shard tiles across TCs (v7x)
            vmem_limit_bytes=32 * 1024 * 1024,          # safe on v5e/v6e/v7x
        ),
        cost_estimate=cost,
    )(w_p, patches, b_p)

    out = out[:cout, :M].reshape(cout, n, h, w)         # (Cout, N, H, W)
    out = jnp.transpose(out, (1, 0, 2, 3))              # leading-axis swap -> NCHW
    return out.astype(x.dtype)


def masked_layer_forward(x, weight, bias,
                         neurons_to_remove=None,
                         last_layer_neurons_subset=None,
                         current_layer_neurons_subset=None):
    """Mirrors MaskedLayer.forward's three branches (layer = Conv2d)."""
    cout = weight.shape[0]
    ones_mask = jnp.ones((cout,), dtype=jnp.float32)

    if neurons_to_remove is not None:
        # branch 1: run layer, then zero whole output channels
        remove = list(neurons_to_remove)
        mask = ones_mask
        if remove:  # guard the empty-set case
            mask = mask.at[jnp.array(remove, dtype=jnp.int32)].set(0.0)
        return conv2d_masked(x, weight, bias, mask)
    elif not (last_layer_neurons_subset is None
              and current_layer_neurons_subset is None):
        # branch 2: zero weight[cur][last] for cur not in current subset,
        # last in last subset, then run layer
        cur_set = set(current_layer_neurons_subset or [])
        current_sep = [i for i in range(cout) if i not in cur_set]
        last = list(last_layer_neurons_subset or [])
        w = weight
        if current_sep and last:
            rows = jnp.array(current_sep, dtype=jnp.int32)
            cols = jnp.array(last, dtype=jnp.int32)
            w = w.at[rows[:, None], cols[None, :]].set(0.0)
        return conv2d_masked(x, w, bias, ones_mask)
    else:
        # branch 3: plain layer
        return conv2d_masked(x, weight, bias, ones_mask)


def _reference_conv(x, weight, bias):
    out = jax.lax.conv_general_dilated(
        x, weight, window_strides=(1, 1), padding="SAME",
        dimension_numbers=("NCHW", "OIHW", "NCHW"))
    return out + bias.reshape(1, -1, 1, 1)


if __name__ == "__main__":
    key = jax.random.PRNGKey(0)
    kx, kw, kb = jax.random.split(key, 3)

    N, Cin, H, W = 2, 4, 16, 16
    Cout, KH, KW = 8, 3, 3

    x = jax.random.normal(kx, (N, Cin, H, W), dtype=jnp.float32)
    weight = jax.random.normal(kw, (Cout, Cin, KH, KW), dtype=jnp.float32) * 0.1
    bias = jax.random.normal(kb, (Cout,), dtype=jnp.float32) * 0.1

    TOL = dict(atol=5e-2, rtol=5e-2)   # bf16 MXU inputs, f32 accumulation

    # branch 3: plain conv
    y_plain = jax.block_until_ready(masked_layer_forward(x, weight, bias))
    ref = _reference_conv(x, weight, bias)
    assert jnp.allclose(y_plain, ref, **TOL), "plain conv mismatch"

    # branch 1: neurons_to_remove -> zeroed output channels
    remove = [1, 3]
    y_removed = jax.block_until_ready(
        masked_layer_forward(x, weight, bias, neurons_to_remove=remove))
    ref_mask = jnp.ones((Cout,)).at[jnp.array(remove)].set(0.0).reshape(1, -1, 1, 1)
    assert jnp.allclose(y_removed, ref * ref_mask, **TOL), "remove-mask mismatch"
    assert jnp.all(y_removed[:, remove] == 0.0), "removed channels not exactly zero"

    # branch 1 edge case: empty removal set behaves like plain conv
    y_empty = jax.block_until_ready(
        masked_layer_forward(x, weight, bias, neurons_to_remove=[]))
    assert jnp.allclose(y_empty, ref, **TOL), "empty-remove mismatch"

    # branch 2: separate -> zero selected weight connections, then conv
    last_subset = [0, 2]
    cur_subset = [0, 1, 4]
    y_sep = jax.block_until_ready(
        masked_layer_forward(x, weight, bias,
                             last_layer_neurons_subset=last_subset,
                             current_layer_neurons_subset=cur_subset))
    sep_rows = jnp.array([i for i in range(Cout) if i not in cur_subset])
    sep_cols = jnp.array(last_subset)
    w_sep = weight.at[sep_rows[:, None], sep_cols[None, :]].set(0.0)
    ref_sep = _reference_conv(x, w_sep, bias)
    assert jnp.allclose(y_sep, ref_sep, **TOL), "separate-weight mismatch"

    print("KERNEL_OK")
</pallas_src>

<mosaic_0001>
module attributes {stable_mosaic.version = 11 : i64} {
  func.func @_conv_kernel(%arg0: i32, %arg1: memref<8x48xbf16, #tpu.memory_space<vmem>>, %arg2: memref<48x512xbf16, #tpu.memory_space<vmem>>, %arg3: memref<8x1xf32, #tpu.memory_space<vmem>>, %arg4: memref<8x512xf32, #tpu.memory_space<vmem>>) attributes {dimension_semantics = [#tpu.dimension_semantics<parallel>], iteration_bounds = array<i64: 1>, scalar_prefetch = 0 : i64, scratch_operands = 0 : i64, tpu.core_type = #tpu.core_type<tc>, window_params = [{pipeline_mode = #tpu.pipeline_mode<synchronous>, transform_indices = @transform_0, window_bounds = array<i64: 8, 48>}, {transform_indices = @transform_1, window_bounds = array<i64: 48, 512>}, {pipeline_mode = #tpu.pipeline_mode<synchronous>, transform_indices = @transform_2, window_bounds = array<i64: 8, 1>}, {transform_indices = @transform_3, window_bounds = array<i64: 8, 512>}]} {
    %c0 = arith.constant 0 : index
    %c0_0 = arith.constant 0 : index
    %0 = vector.load %arg1[%c0, %c0_0] : memref<8x48xbf16, #tpu.memory_space<vmem>>, vector<8x48xbf16>
    %c0_1 = arith.constant 0 : index
    %c0_2 = arith.constant 0 : index
    %1 = vector.load %arg2[%c0_1, %c0_2] : memref<48x512xbf16, #tpu.memory_space<vmem>>, vector<48x512xbf16>
    %cst = arith.constant dense<0.000000e+00> : vector<8x512xf32>
    %2 = tpu.matmul %0, %1, %cst {dimension_numbers = #tpu.dot_dimension_numbers<[1], [0], [0], [1], [0, 0, 1, 1], [], []>} : vector<8x48xbf16>, vector<48x512xbf16>, vector<8x512xf32> -> vector<8x512xf32>
    %c0_3 = arith.constant 0 : index
    %c0_4 = arith.constant 0 : index
    %3 = vector.load %arg3[%c0_3, %c0_4] : memref<8x1xf32, #tpu.memory_space<vmem>>, vector<8x1xf32>
    %4 = vector.broadcast %3 : vector<8x1xf32> to vector<8x512xf32>
    %5 = arith.addf %2, %4 : vector<8x512xf32>
    %c0_5 = arith.constant 0 : index
    %c0_6 = arith.constant 0 : index
    %6 = vector.load %arg4[%c0_5, %c0_6] : memref<8x512xf32, #tpu.memory_space<vmem>>, vector<8x512xf32>
    tpu.vector_store %arg4[%c0_5, %c0_6], %5 {strides = array<i32>} : memref<8x512xf32, #tpu.memory_space<vmem>>, vector<8x512xf32>,
    return
  }
  func.func @transform_0(%arg0: i32) -> (i32, i32) {
    %c0_i32 = arith.constant 0 : i32
    %c0_i32_0 = arith.constant 0 : i32
    %c0_i32_1 = arith.constant 0 : i32
    return %c0_i32, %c0_i32_0 : i32, i32
  }
  func.func @transform_1(%arg0: i32) -> (i32, i32) {
    %c0_i32 = arith.constant 0 : i32
    %c0_i32_0 = arith.constant 0 : i32
    return %c0_i32, %arg0 : i32, i32
  }
  func.func @transform_2(%arg0: i32) -> (i32, i32) {
    %c0_i32 = arith.constant 0 : i32
    %c0_i32_0 = arith.constant 0 : i32
    %c0_i32_1 = arith.constant 0 : i32
    return %c0_i32, %c0_i32_0 : i32, i32
  }
  func.func @transform_3(%arg0: i32) -> (i32, i32) {
    %c0_i32 = arith.constant 0 : i32
    %c0_i32_0 = arith.constant 0 : i32
    return %c0_i32, %arg0 : i32, i32
  }
}

</mosaic_0001>

<bundles_post_ra>
// kernel: conv2d_masked.1
= control target key start
LH: loop header
LB: loop body
LE: loop exit
PB: predicated region body
PF: predicated region fallthrough
CT: control target
= control target key end

     0   :  { %v224_v3 = vmov 0   ;;  %vm94_vm0 = vcmask 392192   ;;  %s335_s1 = inlined_call_operand.vmem [shape: bf16[48,512], index: 1, kind: input, shape index: {}]   ;;  %s336_s2 = inlined_call_operand.vmem [shape: f32[8,1], index: 2, kind: input, shape index: {}]   ;;  %s337_s0 = inlined_call_operand.vmem [shape: bf16[8,48], index: 0, kind: input, shape index: {}]   ;;  %s338_s3 = inlined_call_operand.vmem [shape: f32[8,512], index: 3, kind: output, shape index: {}]  }
   0x1   :  { %v192_v0 = vld [vmem:[%s335_s1 + $0x40] sm:$0xf]  ;;  %v220_v1 = vld [vmem:[%s335_s1 + $0x4c] sm:$0xf0]  ;;  %v218_v2 = vld [vmem:[%s335_s1 + $0x44] sm:$0xf]  ;;  %223 = vset.pattern.permute.xlu0 %v224_v3 }
   0x2   :  { %v193_v4 = vor.u32 %v220_v1, %v192_v0  ;;  %v194_v5 = vld [vmem:[%s335_s1 + $0x50] sm:$0xf0]  ;;  %v200_v6 = vld [vmem:[%s335_s1 + $0x48] sm:$0xf]  ;;  %v221_v7 = vld [vmem:[%s335_s1 + $0x54] sm:$0xf0] }
   0x3   :  { %v197_v8 = vor.u32 %v218_v2, %v194_v5  ;;  %v201_v9 = vor.u32 %v221_v7, %v200_v6  ;;  %v219_v10 = vld [vmem:[%s335_s1 + $0x4c] sm:$0xf]  ;;  %v202_v11 = vld [vmem:[%s335_s1 + $0x58] sm:$0xf0]  ;;  %v176_v12 = vld [vmem:[%s335_s1 + $0x20] sm:$0xf] }
   0x4   :  { %103 = vmatpush.bf16.msra.mxu0 %v193_v4  ;;  %v205_v13 = vor.u32 %v219_v10, %v202_v11  ;;  %v216_v14 = vld [vmem:[%s335_s1 + $0x2c] sm:$0xf0]  ;;  %v214_v15 = vld [vmem:[%s335_s1 + $0x24] sm:$0xf]  ;;  %v178_v16 = vld [vmem:[%s335_s1 + $0x30] sm:$0xf0] }
   0x5   :  { %116 = vmatpush.bf16.msra.mxu1 %v197_v8  ;;  %129 = vmatpush.bf16.msra.mxu2 %v201_v9  ;;  %v177_v17 = vor.u32 %v216_v14, %v176_v12  ;;  %v181_v18 = vor.u32 %v214_v15, %v178_v16  ;;  %v184_v19 = vld [vmem:[%s335_s1 + $0x28] sm:$0xf]  ;;  %v217_v20 = vld [vmem:[%s335_s1 + $0x34] sm:$0xf0]  ;;  %v215_v21 = vld [vmem:[%s335_s1 + $0x2c] sm:$0xf] }
   0x6   :  { %142 = vmatpush.bf16.msra.mxu3 %v205_v13  ;;  %v185_v22 = vor.u32 %v217_v20, %v184_v19  ;;  %v186_v23 = vld [vmem:[%s335_s1 + $0x38] sm:$0xf0]  ;;  %v160_v24 = vld [vmem:[%s335_s1] sm:$0xf]  ;;  %v212_v25 = vld [vmem:[%s335_s1 + $0xc] sm:$0xf0] }
   0x7   :  { %v189_v26 = vor.u32 %v215_v21, %v186_v23  ;;  %v210_v27 = vld [vmem:[%s335_s1 + $0x4] sm:$0xf]  ;;  %v162_v28 = vld [vmem:[%s335_s1 + $0x10] sm:$0xf0]  ;;  %v168_v29 = vld [vmem:[%s335_s1 + $0x8] sm:$0xf]  ;;  %v161_v30 = vor.u32 %v212_v25, %v160_v24 }
   0x8   :  { %104 = vmatpush.bf16.msra.mxu0 %v177_v17  ;;  %v213_v31 = vld [vmem:[%s335_s1 + $0x14] sm:$0xf0]  ;;  %v211_v32 = vld [vmem:[%s335_s1 + $0xc] sm:$0xf]  ;;  %v170_v33 = vld [vmem:[%s335_s1 + $0x18] sm:$0xf0]  ;;  %v165_v34 = vor.u32 %v210_v27, %v162_v28 }
   0x9   :  { %117 = vmatpush.bf16.msra.mxu1 %v181_v18  ;;  %130 = vmatpush.bf16.msra.mxu2 %v185_v22  ;;  %v169_v35 = vor.u32 %v213_v31, %v168_v29  ;;  %v28_v36 = vld [vmem:[%s336_s2] sm:$0xff]  ;;  %v173_v37 = vor.u32 %v211_v32, %v170_v33 }
   0xa   :  { %143 = vmatpush.bf16.msra.mxu3 %v189_v26  ;;  %31 = vperm.xlu0 %223, %v28_v36   ;;  %v15_v38 = vld [vmem:[%s337_s0] sm:$0xf] }
   0xc   :  { %105 = vmatpush.bf16.msra.mxu0 %v161_v30 }
   0xd   :  { %118 = vmatpush.bf16.msra.mxu1 %v165_v34  ;;  %131 = vmatpush.bf16.msra.mxu2 %v169_v35 }
   0xe   :  { %144 = vmatpush.bf16.msra.mxu3 %v173_v37 }
   0xf   :  { %206 = vmatmul.msk.bf16.vlgmr.msra.gmra.mxu0 %vm94_vm0, %v15_v38 }
  0x10   :  { %207 = vmatmul.msk.bf16.vlgmr.msra.gmra.mxu1 %vm94_vm0, %v15_v38  ;;  %208 = vmatmul.msk.bf16.vlgmr.msra.gmra.mxu2 %vm94_vm0, %v15_v38 }
  0x11   :  { %209 = vmatmul.msk.bf16.vlgmr.msra.gmra.mxu3 %vm94_vm0, %v15_v38 }
  0x7c   :  { %v32_v39 = vpop.permute.xlu0 %31 }
  0x8c   :  { %v107_v40 = vpop.f32.mrf.mxu0 }
  0x8d   :  { %v120_v41 = vpop.f32.mrf.mxu1  ;;  %v108_v42 = vadd.f32 %v107_v40, %v32_v39 }
  0x8e   :  { %v121_v43 = vadd.f32 %v120_v41, %v32_v39 }
  0x8f   :  { %150 = vst [vmem:[%s338_s3] sm:$0xff] %v108_v42 }
  0x90   :  { %151 = vst [vmem:[%s338_s3 + $0x8] sm:$0xff] %v121_v43 }
  0x93   :  { %v133_v44 = vpop.f32.mrf.mxu2 }
  0x94   :  { %v134_v45 = vadd.f32 %v133_v44, %v32_v39  ;;  %v146_v46 = vpop.f32.mrf.mxu3  ;;  %v109_v47 = vpop.f32.mrf.mxu0 }
  0x95   :  { %v147_v48 = vadd.f32 %v146_v46, %v32_v39  ;;  %v122_v49 = vpop.f32.mrf.mxu1 }
  0x96   :  { %152 = vst [vmem:[%s338_s3 + $0x10] sm:$0xff] %v134_v45 }
  0x97   :  { %153 = vst [vmem:[%s338_s3 + $0x18] sm:$0xff] %v147_v48 }
  0x9b   :  { %v135_v50 = vpop.f32.mrf.mxu2 }
  0x9c   :  { %v148_v51 = vpop.f32.mrf.mxu3 }

</bundles_post_ra>
